<compile_context>
chip_gen: v6e
topology: v6e:2x2x1
jax: 0.10.0
libtpu: 0.0.40
codegen_flags: <defaults>
</compile_context>

<pallas_src>
import functools

import jax
import jax.numpy as jnp
from jax.experimental import pallas as pl
from jax.experimental.pallas import tpu as pltpu

_LANE = 128
_MAX_LOGITS_BLOCK_BYTES = 12 * 1024 * 1024  # per-block DMA cap (sweep 4/8/12 MiB)
_VMEM_BUDGET_FRACTION = 0.55                # fraction of vmem_limit used by the per-step accounting


def _sublane_multiple(dtype) -> int:
    # Sublane packing granularity: 8 rows for 4-byte, 16 for 2-byte, 32 for 1-byte.
    itemsize = jnp.dtype(dtype).itemsize
    return max(8, 32 // itemsize)


def _round_up(x: int, m: int) -> int:
    return ((x + m - 1) // m) * m


def _vmem_limit_bytes() -> int:
    """Scoped-VMEM limit to request: ~90% of physical, clamped to [32, 128] MiB."""
    cap = None
    try:
        info = pltpu.get_tpu_info()
        cap = getattr(info, "vmem_capacity_bytes", None)
    except Exception:
        cap = None
    if not cap:
        cap = 64 * 1024 * 1024  # conservative fallback (v7x per-TensorCore)
    limit = int(cap * 0.9)
    return max(32 * 1024 * 1024, min(limit, 128 * 1024 * 1024))


def _auto_tile_rows(n: int, c: int, dtype, vmem_limit: int) -> int:
    itemsize = jnp.dtype(dtype).itemsize
    sub = _sublane_multiple(dtype)
    c_lanes = _round_up(c, _LANE)  # VMEM lane padding for C not a multiple of 128
    # Per-row VMEM bytes per grid step:
    #   2 x native-dtype logits block (double-buffered)
    #   2 x (tile_n, 1) int32 targets block, lane-padded to 128 lanes (512 B/row)
    #   ~2 x f32 temporaries (exp feed / reductions), conservative upper bound
    per_row = 2 * c_lanes * itemsize + 2 * _LANE * 4 + 2 * c_lanes * 4
    budget = int(vmem_limit * _VMEM_BUDGET_FRACTION)
    tile = budget // per_row
    # Cap the logits block itself: beyond ~12 MiB the per-step overhead is
    # already fully amortized and latency/compile time grow.
    tile = min(tile, _MAX_LOGITS_BLOCK_BYTES // max(1, c_lanes * itemsize))
    tile = max(sub, (tile // sub) * sub)
    return min(tile, _round_up(n, sub))


def _focal_loss_kernel(logits_ref, targets_ref, partial_ref, *, alpha, gamma,
                       n_rows, tile_n):
    # logits_ref:  (tile_n, C) float (bf16 or f32) in VMEM
    # targets_ref: (tile_n, 1) int32 in VMEM
    # partial_ref: (1, 8, 128) f32 in VMEM -- this tile's partial sum (broadcast)
    pid = pl.program_id(0)

    x_nat = logits_ref[...]                                    # (tile_n, C), native dtype
    t = targets_ref[...]                                       # (tile_n, 1) int32

    # Row max on the native-dtype block (monotonic -> exact after f32 cast);
    # avoids materializing a full f32 copy just for the max pass.
    m = jnp.max(x_nat, axis=-1, keepdims=True).astype(jnp.float32)   # (tile_n, 1)

    # Target-class logit gathered from the native-dtype block: the masked sum
    # has a single non-zero term per row, so it is exact even in bf16.
    col = jax.lax.broadcasted_iota(jnp.int32, x_nat.shape, dimension=1)
    zero = jnp.array(0, dtype=x_nat.dtype)
    tgt = jnp.sum(jnp.where(col == t, x_nat, zero),
                  axis=-1, keepdims=True).astype(jnp.float32)        # (tile_n, 1)

    # Single fused cast+shift feeding the EUP exp; only ~1x f32 tile live.
    sum_exp = jnp.sum(jnp.exp(x_nat.astype(jnp.float32) - m),
                      axis=-1, keepdims=True)                        # (tile_n, 1)

    # Cross-entropy (reduction='none').  Clamp tiny negative rounding to 0 so
    # pt <= 1 and the focal weight base never goes negative.
    ce = jnp.maximum(jnp.log(sum_exp) + m - tgt, 0.0)                # (tile_n, 1)

    pt = jnp.exp(-ce)
    one_minus_pt = 1.0 - pt

    # (1 - pt) ** gamma: integer gamma -> repeated VALU multiplies (avoids a
    # second EUP transcendental chain from float pow = exp(g*log(.))).
    g = float(gamma)
    if g == int(g) and g >= 0:
        gi = int(g)
        if gi == 0:
            w = jnp.ones_like(one_minus_pt)
        else:
            w = one_minus_pt
            for _ in range(gi - 1):
                w = w * one_minus_pt
    else:
        w = jnp.maximum(one_minus_pt, 0.0) ** g

    focal = alpha * w * ce                                           # (tile_n, 1)

    # Mask padded rows of a partial last tile out of the sum.  Keep this a
    # select (not multiply-by-mask): garbage rows may hold inf/NaN.
    row = pid * tile_n + jax.lax.broadcasted_iota(jnp.int32, (tile_n, 1), 0)
    focal = jnp.where(row < n_rows, focal, 0.0)

    tile_sum = jnp.sum(focal)                                        # scalar

    # Lane/sublane-dense partial-sum slab; the wrapper reads [tile, 0, 0].
    partial_ref[...] = jnp.full(partial_ref.shape, tile_sum, dtype=jnp.float32)


def focal_loss(logits, targets, alpha=1.0, gamma=2.0, *, tile_n=None):
    """Focal loss with reduction='mean'.

    logits: (N, C) float32 or bfloat16, targets: (N,) integer class indices.
    Returns a scalar float32.
    """
    n, c = logits.shape
    itemsize = jnp.dtype(logits.dtype).itemsize
    sub = _sublane_multiple(logits.dtype)
    vmem_limit = _vmem_limit_bytes()

    if tile_n is None:
        tile_n = _auto_tile_rows(n, c, logits.dtype, vmem_limit)
    else:
        tile_n = max(sub, (int(tile_n) // sub) * sub)
        tile_n = min(tile_n, _round_up(n, sub))

    num_tiles = pl.cdiv(n, tile_n)
    targets2d = targets.astype(jnp.int32).reshape(n, 1)

    kernel = functools.partial(
        _focal_loss_kernel, alpha=float(alpha), gamma=float(gamma),
        n_rows=n, tile_n=tile_n)

    cost = pl.CostEstimate(
        flops=8 * n * c,
        transcendentals=n * c + 2 * n,
        bytes_accessed=n * c * itemsize + n * 4 + num_tiles * 8 * 128 * 4)

    partials = pl.pallas_call(
        kernel,
        out_shape=jax.ShapeDtypeStruct((num_tiles, 8, 128), jnp.float32),
        grid=(num_tiles,),
        in_specs=[
            pl.BlockSpec((tile_n, c), lambda i: (i, 0)),
            pl.BlockSpec((tile_n, 1), lambda i: (i, 0)),
        ],
        out_specs=pl.BlockSpec((1, 8, 128), lambda i: (i, 0, 0)),
        compiler_params=pltpu.CompilerParams(
            dimension_semantics=("parallel",),
            vmem_limit_bytes=vmem_limit),
        cost_estimate=cost,
    )(logits, targets2d)

    # Finish the mean: tiny reduction over per-tile partial sums.
    return jnp.sum(partials[:, 0, 0]) / jnp.float32(n)


def _reference_focal_loss(logits, targets, alpha=1.0, gamma=2.0):
    # Pure-JAX reference matching F.cross_entropy(reduction='none') semantics.
    logp = jax.nn.log_softmax(logits.astype(jnp.float32), axis=-1)
    ce = -jnp.take_along_axis(logp, targets[:, None].astype(jnp.int32), axis=-1)[:, 0]
    pt = jnp.exp(-ce)
    return jnp.mean(alpha * (1.0 - pt) ** gamma * ce)


if __name__ == "__main__":
    key = jax.random.PRNGKey(0)
    k1, k2, k3, k4 = jax.random.split(key, 4)

    # Case 1: bf16 logits, N not a multiple of the tile -> exercises the
    # multi-tile grid, padded-row masking, and the in-kernel bf16->f32 cast.
    N, C = 20, 128
    logits_bf16 = jax.random.normal(k1, (N, C), dtype=jnp.float32).astype(jnp.bfloat16)
    targets = jax.random.randint(k2, (N,), 0, C, dtype=jnp.int32)

    loss = focal_loss(logits_bf16, targets, alpha=1.0, gamma=2.0, tile_n=16)
    loss = jax.block_until_ready(loss)
    ref = _reference_focal_loss(logits_bf16, targets, alpha=1.0, gamma=2.0)
    assert jnp.allclose(loss, ref, atol=1e-5, rtol=1e-5), (loss, ref)

    # Case 2: f32 logits, auto tile size (single-tile path, VMEM-derived budget).
    N2, C2 = 8, 128
    logits_f32 = jax.random.normal(k3, (N2, C2), dtype=jnp.float32)
    targets2 = jax.random.randint(k4, (N2,), 0, C2, dtype=jnp.int32)
    loss2 = jax.block_until_ready(focal_loss(logits_f32, targets2))
    ref2 = _reference_focal_loss(logits_f32, targets2)
    assert jnp.allclose(loss2, ref2, atol=1e-5, rtol=1e-5), (loss2, ref2)

    print("KERNEL_OK")
</pallas_src>

<mosaic_0001>
module attributes {stable_mosaic.version = 11 : i64} {
  func.func @_focal_loss_kernel(%arg0: i32, %arg1: memref<16x128xbf16, #tpu.memory_space<vmem>>, %arg2: memref<16x1xi32, #tpu.memory_space<vmem>>, %arg3: memref<1x8x128xf32, #tpu.memory_space<vmem>>) attributes {dimension_semantics = [#tpu.dimension_semantics<parallel>], iteration_bounds = array<i64: 2>, scalar_prefetch = 0 : i64, scratch_operands = 0 : i64, tpu.core_type = #tpu.core_type<tc>, window_params = [{transform_indices = @transform_0, window_bounds = array<i64: 16, 128>}, {transform_indices = @transform_1, window_bounds = array<i64: 16, 1>}, {transform_indices = @transform_2, window_bounds = array<i64: 1, 8, 128>}]} {
    %c0 = arith.constant 0 : index
    %c0_0 = arith.constant 0 : index
    %0 = vector.load %arg1[%c0, %c0_0] : memref<16x128xbf16, #tpu.memory_space<vmem>>, vector<16x128xbf16>
    %c0_1 = arith.constant 0 : index
    %c0_2 = arith.constant 0 : index
    %1 = vector.load %arg2[%c0_1, %c0_2] : memref<16x1xi32, #tpu.memory_space<vmem>>, vector<16x1xi32>
    %cst = arith.constant dense<0xFF80> : vector<16xbf16>
    %2 = vector.multi_reduction <maximumf>, %0, %cst [1] : vector<16x128xbf16> to vector<16xbf16>
    %3 = vector.shape_cast %2 : vector<16xbf16> to vector<16x1xbf16>
    %4 = arith.extf %3 : vector<16x1xbf16> to vector<16x1xf32>
    %5 = tpu.iota {dimensions = array<i32: 1>} : vector<16x128xi32>
    %6 = vector.broadcast %1 : vector<16x1xi32> to vector<16x128xi32>
    %7 = arith.cmpi eq, %5, %6 : vector<16x128xi32>
    %cst_3 = arith.constant 0.000000e+00 : bf16
    %8 = vector.broadcast %cst_3 : bf16 to vector<16x128xbf16>
    %9 = arith.select %7, %0, %8 : vector<16x128xi1>, vector<16x128xbf16>
    %10 = arith.extf %9 : vector<16x128xbf16> to vector<16x128xf32>
    %cst_4 = arith.constant dense<0.000000e+00> : vector<16xf32>
    %11 = vector.multi_reduction <add>, %10, %cst_4 [1] : vector<16x128xf32> to vector<16xf32>
    %12 = vector.shape_cast %11 : vector<16xf32> to vector<16x1xf32>
    %13 = arith.truncf %12 : vector<16x1xf32> to vector<16x1xbf16>
    %14 = arith.extf %13 : vector<16x1xbf16> to vector<16x1xf32>
    %15 = arith.extf %0 : vector<16x128xbf16> to vector<16x128xf32>
    %16 = vector.broadcast %4 : vector<16x1xf32> to vector<16x128xf32>
    %17 = arith.subf %15, %16 : vector<16x128xf32>
    %18 = math.exp %17 : vector<16x128xf32>
    %cst_5 = arith.constant dense<0.000000e+00> : vector<16xf32>
    %19 = vector.multi_reduction <add>, %18, %cst_5 [1] : vector<16x128xf32> to vector<16xf32>
    %20 = vector.shape_cast %19 : vector<16xf32> to vector<16x1xf32>
    %21 = math.log %20 : vector<16x1xf32>
    %22 = arith.addf %21, %4 : vector<16x1xf32>
    %23 = arith.subf %22, %14 : vector<16x1xf32>
    %cst_6 = arith.constant 0.000000e+00 : f32
    %24 = vector.broadcast %cst_6 : f32 to vector<16x1xf32>
    %25 = arith.maximumf %23, %24 : vector<16x1xf32>
    %cst_7 = arith.constant 0.000000e+00 : f32
    %26 = vector.broadcast %cst_7 : f32 to vector<16x1xf32>
    %27 = arith.subf %26, %25 : vector<16x1xf32>
    %28 = math.exp %27 : vector<16x1xf32>
    %cst_8 = arith.constant 1.000000e+00 : f32
    %29 = vector.broadcast %cst_8 : f32 to vector<16x1xf32>
    %30 = arith.subf %29, %28 : vector<16x1xf32>
    %31 = arith.mulf %30, %30 : vector<16x1xf32>
    %cst_9 = arith.constant 1.000000e+00 : f32
    %32 = vector.broadcast %cst_9 : f32 to vector<16x1xf32>
    %33 = arith.mulf %32, %31 : vector<16x1xf32>
    %34 = arith.mulf %33, %25 : vector<16x1xf32>
    %c16_i32 = arith.constant 16 : i32
    %35 = arith.muli %arg0, %c16_i32 : i32
    %36 = tpu.iota {dimensions = array<i32: 0>} : vector<16x1xi32>
    %37 = vector.broadcast %35 : i32 to vector<16x1xi32>
    %38 = arith.addi %37, %36 : vector<16x1xi32>
    %c20_i32 = arith.constant 20 : i32
    %39 = vector.broadcast %c20_i32 : i32 to vector<16x1xi32>
    %40 = arith.cmpi slt, %38, %39 : vector<16x1xi32>
    %cst_10 = arith.constant 0.000000e+00 : f32
    %41 = vector.broadcast %cst_10 : f32 to vector<16x1xf32>
    %42 = arith.select %40, %34, %41 : vector<16x1xi1>, vector<16x1xf32>
    %43 = vector.shape_cast %42 : vector<16x1xf32> to vector<1x16x1xf32>
    %cst_11 = arith.constant dense<0.000000e+00> : vector<1xf32>
    %44 = vector.multi_reduction <add>, %43, %cst_11 [1, 2] : vector<1x16x1xf32> to vector<1xf32>
    %45 = vector.shape_cast %44 : vector<1xf32> to vector<1x1x1xf32>
    %46 = vector.extract %45[0, 0, 0] : f32 from vector<1x1x1xf32>
    %47 = vector.broadcast %46 : f32 to vector<1x8x128xf32>
    %c0_12 = arith.constant 0 : index
    %c0_13 = arith.constant 0 : index
    %c0_14 = arith.constant 0 : index
    %48 = vector.load %arg3[%c0_12, %c0_13, %c0_14] : memref<1x8x128xf32, #tpu.memory_space<vmem>>, vector<1x8x128xf32>
    tpu.vector_store %arg3[%c0_12, %c0_13, %c0_14], %47 {strides = array<i32>} : memref<1x8x128xf32, #tpu.memory_space<vmem>>, vector<1x8x128xf32>,
    return
  }
  func.func @transform_0(%arg0: i32) -> (i32, i32) {
    %c0_i32 = arith.constant 0 : i32
    %c0_i32_0 = arith.constant 0 : i32
    return %arg0, %c0_i32 : i32, i32
  }
  func.func @transform_1(%arg0: i32) -> (i32, i32) {
    %c0_i32 = arith.constant 0 : i32
    %c0_i32_0 = arith.constant 0 : i32
    return %arg0, %c0_i32 : i32, i32
  }
  func.func @transform_2(%arg0: i32) -> (i32, i32, i32) {
    %c0_i32 = arith.constant 0 : i32
    %c0_i32_0 = arith.constant 0 : i32
    %c0_i32_1 = arith.constant 0 : i32
    return %arg0, %c0_i32, %c0_i32_0 : i32, i32, i32
  }
}

</mosaic_0001>

<bundles_post_ra>
// kernel: tpu_custom_call.1
= control target key start
LH: loop header
LB: loop body
LE: loop exit
PB: predicated region body
PF: predicated region fallthrough
CT: control target
= control target key end

     0   :  { %7 = vsyncpa [#allocation3], 0  ;;  %s636_s0 = inlined_call_operand.vmem [shape: bf16[20,128], index: 0, kind: input, shape index: {}]   ;;  %s637_s1 = inlined_call_operand.vmem [shape: s32[20,1], index: 1, kind: input, shape index: {}]   ;;  %s638_s2 = inlined_call_operand.hbm [shape: f32[2,8,128], index: 2, kind: output, shape index: {}]  }
   0x1   :  { %9 = vsyncpa [#allocation3 + $0x1], 0  ;;  %s540_s9 = smov 0   ;;  %s542_s10 = smov 0  }
   0x2   :  { %s544_s11 = smov 0   ;;  %s546_s12 = smov 0  }
   0x3 LB: > { %s561_s13 = sadd.s32 4294967295, %s521_s12   ;;  %s389_s14 = sadd.s32 4294967294, %s521_s12   ;;  %s521_s12 = sphi %s546_s12, %s644_s12   ;;  %s517_s11 = sphi %s544_s11, %s643_s11   ;;  %s513_s10 = sphi %s542_s10, %s642_s10   ;;  %s509_s9 = sphi %s540_s9, %s641_s9  }
   0x4   : > { %s565_s15 = sadd.s32 1, %s521_s12   ;;  %s74_s16 = sadd.s32 1, %s517_s11 }
   0x5   : > { %s71_s17 = ssub.s32 %s521_s12, %s565_s15  ;;  %p84_p0 = scmp.ne.s32.totalorder %s517_s11, %s513_s10 }
   0x6   : > { %p72_p1 = scmp.eq.s32.totalorder %s71_s17, 0  ;;  %p85_p2 = scmp.eq.s32.totalorder %s561_s13, 1 }
   0x7   : > { %p90_p3 = scmp.ne.s32.totalorder %s513_s10, %s509_s9  ;;  %p91_p4 = scmp.eq.s32.totalorder %s389_s14, 1 }
   0x8   : > { %s576_s18 = scalar_select %p72_p1, %s517_s11, %s74_s16  }
   0x9   : > { %p578_p5 = por %p85_p2, %p84_p0  ;;  %p582_p6 = por %p91_p4, %p90_p3 }
   0xa   : > { %p392_p7 = scmp.ge.s32.totalorder %s521_s12, 1  ;;  %p143_p8 = scmp.lt.s32.totalorder %s521_s12, 3 }
   0xc   : > { %p144_p9 = pnand %p392_p7, %p143_p8 }
   0xd   : > { %s394_s21 = sshll.u32 (!%p144_p9), %s561_s13, 1  ;;  %s399_s30 = sshll.u32 (!%p144_p9), %s561_s13, 4 }
   0xe   : > { %147 = sbr.rel (%p144_p9) target bundleno = 593 (0x251), region = 28  ;;  %p183_p10 = scmp.lt.s32.totalorder (!%p144_p9), %s394_s21, 2 }
   0xf   : > { %s175_s3 = sand.u32 (!%p144_p9), 1, %s513_s10   ;;  %s401_s7 = sshll.u32 (!%p144_p9), %s561_s13, 7 }
  0x10   : > { %s393_s4 = sshll.u32 (!%p144_p9), %s175_s3, 3  ;;  %s316_s17 = scalar_lea.hbm (!%p144_p9), %s638_s2, %s401_s7 }
  0x11   : > { %s177_s5 = scalar_lea.vmem (!%p144_p9), [#allocation2], %s393_s4 }
  0x12   : > { %s318_s6 = sshll.u32 (!%p144_p9), %s177_s5, 4  ;;  %s598_s6 = int_to_ptr.vmem [resolvable:$true] %s318_s6 }
  0x13   : > { %v523_v0 = vmov 0   ;;  %s646_s21 = smov (!%p183_p10, %s394_s21), 2  ;;  %v221_v15 = vlaneseq  ;;  %v282_v47 = vstv %s399_s30  ;;  %vm289_vm6 = vcmask 7168  }
  0x14   : > { %446 = vset.pattern.permute.xlu0 %v523_v0  ;;  %447 = vset.pattern.permute.xlu1 %v523_v0  ;;  %s395_s22 = sshll.u32 %s646_s21, 2  ;;  %s397_s23 = sshll.u32 %s646_s21, 3 }
  0x15   : > { %s186_s26 = scalar_lea.vmem %s636_s0, %s395_s22  ;;  %s200_s29 = scalar_lea.vmem %s637_s1, %s397_s23  ;;  %v222_v16 = vand.u32 127, %v221_v15  ;;  %v280_v46 = vshrl.u32 %v221_v15, 7 }
  0x16   : > { %v207_v1 = vld [vmem:[%s186_s26] sm:$0xf]  ;;  %v208_v2 = vld [vmem:[%s186_s26 + $0x4] sm:$0xf]  ;;  %v210_v4 = vld [vmem:[%s200_s29 + $0x8] sm:$0xff]  ;;  %s305_s21 = scalar_lea.sflag [#allocation3], %s175_s3 }
  0x17   : > { %v398_v3 = vcombine.low %v207_v1, %v208_v2  ;;  %227 = vperm.xlu1 %447, %v210_v4   ;;  %v209_v5 = vld [vmem:[%s200_s29] sm:$0xff]  ;;  %v244_v6 = vunpack.c.l.bf16 %v207_v1  ;;  %v245_v7 = vunpack.c.l.bf16 %v208_v2  ;;  %v281_v49 = vadd.s32 8, %v280_v46  ;;  %s461_s22 = scalar_lea.vmem %s598_s6, 128  ;;  %s524_s23 = smov [#allocation2]  }
  0x18   : > { %v283_v51 = vadd.s32 %v282_v47, %v280_v46  ;;  %p462_p11 = scmp.ne.s32.totalorder %s598_s6, %s461_s22  ;;  %s465_s13 = sshll.u32 %s524_s23, 4  ;;  %s466_s13 = int_to_ptr.vmem [resolvable:$false] %s465_s13 }
  0x19   : > { %217 = vmax.xlane.bf16.xlu0 %v398_v3  ;;  %v284_v54 = vadd.s32 %v282_v47, %v281_v49  ;;  %s467_s24 = scalar_lea.vmem %s466_s13, 256  ;;  %p468_p0 = scmp.lt.s32.totalorder %s598_s6, %s466_s13 }
  0x1a   : > { %vm285_vm4 = vcmp.lt.s32.totalorder %v283_v51, 20  ;;  %p463_p12 = pnand %p462_p11, %p578_p5  ;;  %p469_p1 = scmp.lt.s32.totalorder %s467_s24, %s461_s22 }
  0x1b   : > { %vm286_vm5 = vcmp.lt.s32.totalorder %v284_v54, 20 }
  0x1c   : > { %p464_p13 = pneg %p463_p12  ;;  %p470_p2 = por %p469_p1, %p468_p0 }
  0x1e   : > { %p471_p3 = pnand %p470_p2, %p464_p13 }
  0x33   : > { %224 = vperm.xlu0 %446, %v209_v5  }
  0x92   : > { %v228_v18 = vpop.permute.xlu1 %227 }
  0x93   : > { %vm230_vm2 = vcmp.eq.s32.totalorder %v222_v16, %v228_v18 }
  0x94   : > { %vm232_vm3 = vmpackc.low %vm230_vm2, %vm230_vm2 }
  0x95   : > { %v234_v23 = vsel %vm232_vm3, %v208_v2, 0 }
  0x96   : > { %v236_v24 = vunpack.c.l.bf16 %v234_v23 }
  0xa6   : > { %v218_v8 = vpop.xlane.xlu0 %217 }
  0xa7   : > { %v219_v9 = vunpack.c.l.bf16 %v218_v8  ;;  %v220_v10 = vunpack.c.h.bf16 %v218_v8 }
  0xa9   : > { %v246_v11 = vsub.f32 %v244_v6, %v219_v9  ;;  %v247_v12 = vsub.f32 %v245_v7, %v220_v10 }
  0xab   : > { %v248_v13 = vmul.f32 1.442695, %v246_v11  ;;  %v250_v14 = vmul.f32 1.442695, %v247_v12 }
  0xad   : > { %449 = vpow2.f32 %v248_v13 }
  0xae   : > { %451 = vpow2.f32 %v250_v14  ;;  %v225_v17 = vpop.permute.xlu0 %224 }
  0xaf   : > { %vm229_vm0 = vcmp.eq.s32.totalorder %v222_v16, %v225_v17 }
  0xb0   : > { %vm231_vm1 = vmpackc.low %vm229_vm0, %vm229_vm0 }
  0xb1   : > { %v233_v20 = vsel %vm231_vm1, %v207_v1, 0 }
  0xb2   : > { %v235_v22 = vunpack.c.l.bf16 %v233_v20 }
  0xba   : > { %v450_v19 = vpop.eup %449 }
  0xbb   : > { %252 = vadd.xlane.f32.xlu1 %v450_v19  ;;  %v452_v21 = vpop.eup %451 }
  0xbf   : > { %254 = vadd.xlane.f32.xlu1 %v452_v21 }
  0xc3   : > { %237 = vadd.xlane.f32.xlu1 %v235_v22 }
  0xc7   : > { %239 = vadd.xlane.f32.xlu1 %v236_v24 }
 0x144   : > { %v253_v25 = vpop.xlane.xlu1 %252 }
 0x145   : > { %453 = vlog2.f32 %v253_v25 }
 0x148   : > { %v255_v26 = vpop.xlane.xlu1 %254 }
 0x149   : > { %455 = vlog2.f32 %v255_v26 }
 0x14c   : > { %v238_v27 = vpop.xlane.xlu1 %237 }
 0x150   : > { %v240_v28 = vpop.xlane.xlu1 %239 }
 0x151   : > { %v241_v29 = vpack.c.bf16 %v240_v28, %v238_v27 }
 0x152   : > { %v454_v30 = vpop.eup %453 }
 0x153   : > { %v257_v31 = vmul.f32 0.6931472, %v454_v30  ;;  %v242_v32 = vunpack.c.l.bf16 %v241_v29  ;;  %v243_v38 = vunpack.c.h.bf16 %v241_v29 }
 0x155   : > { %v260_v33 = vadd.f32 %v257_v31, %v219_v9 }
 0x156   : > { %v456_v34 = vpop.eup %455 }
 0x157   : > { %v259_v35 = vmul.f32 0.6931472, %v456_v34  ;;  %v262_v36 = vsub.f32 %v260_v33, %v242_v32 }
 0x159   : > { %v261_v37 = vadd.f32 %v259_v35, %v220_v10  ;;  %v264_v39 = vmax.f32 %v262_v36, 0.0 }
 0x15b   : > { %v263_v40 = vsub.f32 %v261_v37, %v243_v38  ;;  %v266_v41 = vsub.f32 0.0, %v264_v39 }
 0x15d   : > { %v265_v42 = vmax.f32 %v263_v40, 0.0  ;;  %v268_v43 = vmul.f32 1.442695, %v266_v41 }
 0x15f   : > { %v267_v44 = vsub.f32 0.0, %v265_v42  ;;  %457 = vpow2.f32 %v268_v43 }
 0x161   : > { %v270_v45 = vmul.f32 1.442695, %v267_v44 }
 0x163   : > { %459 = vpow2.f32 %v270_v45 }
 0x16c   : > { %v458_v48 = vpop.eup %457 }
 0x16d   : > { %v272_v50 = vsub.f32 1.0, %v458_v48 }
 0x16f   : > { %v274_v52 = vmul.f32 %v272_v50, %v272_v50 }
 0x170   : > { %v460_v53 = vpop.eup %459 }
 0x171   : > { %v273_v55 = vsub.f32 1.0, %v460_v53  ;;  %v276_v56 = vmul.f32 %v274_v52, %v264_v39 }
 0x173   : > { %v275_v57 = vmul.f32 %v273_v55, %v273_v55  ;;  %v287_v59 = vsel %vm285_vm4, %v276_v56, 0.0 }
 0x174   : > { %v290_v61 = vsel %vm289_vm6, %v287_v59, 0.0 }
 0x175   : > { %v277_v58 = vmul.f32 %v275_v57, %v265_v42 }
 0x177   : > { %v288_v60 = vsel %vm286_vm5, %v277_v58, 0.0 }
 0x178   : > { %v291_v62 = vsel %vm289_vm6, %v288_v60, 0.0 }
 0x179   : > { %v292_v63 = vadd.f32 %v291_v62, %v290_v61 }
 0x17b   : > { %293 = vadd.xlane.f32.xlu1 %v292_v63 }
 0x204   : > { %v294_v0 = vpop.xlane.xlu1 %293 }
 0x205   : > { %v295_v1 = vrot.slane %v294_v0, 4 }
 0x207   : > { %v296_v2 = vadd.f32 %v295_v1, %v294_v0 }
 0x209   : > { %v297_v3 = vrot.slane %v296_v2, 2 }
 0x20b   : > { %v298_v4 = vadd.f32 %v297_v3, %v296_v2 }
 0x20d   : > { %v299_v5 = vrot.slane %v298_v4, 1 }
 0x20f   : > { %v300_v6 = vadd.f32 %v299_v5, %v298_v4 }
 0x211   : > { %404 = vpush %v300_v6 }
 0x242   : > { %s405_s8 = spop %404 }
 0x243   : > { %v302_v7 = vstv %s405_s8 }
 0x244   : > { %303 = vst [vmem:[%s177_s5] sm:$0xff] %v302_v7 }
 0x245   : > { %474 = shalt.err (!%p471_p3)
}
 0x246   : > { %s475_s25 = scalar_lea.hbm %s316_s17, 128  ;;  %s479_s28 = scalar_lea.hbm %s638_s2, 256 }
 0x247   : > { %p476_p4 = scmp.ne.s32.totalorder %s316_s17, %s475_s25  ;;  %p480_p9 = scmp.lt.s32.totalorder %s316_s17, %s638_s2 }
 0x248   : > { %p481_p10 = scmp.lt.s32.totalorder %s479_s28, %s475_s25 }
 0x249   : > { %p477_p7 = pnand %p476_p4, %p578_p5 }
 0x24a   : > { %p482_p11 = por %p481_p10, %p480_p9 }
 0x24b   : > { %p478_p8 = pneg %p477_p7 }
 0x24d   : > { %p483_p12 = pnand %p482_p11, %p478_p8 }
 0x24f   : > { %486 = shalt.err (!%p483_p12)
}
 0x250   : > { %406 = dma.vmem_to_hbm [thread:$0]  (%p578_p5), %s598_s6, 128, %s316_s17, %s305_s21  }
 0x251 PF: > { %p412_p13 = scmp.ge.s32.totalorder %s521_s12, 2  ;;  %s330_s3 = sand.u32 1, %s509_s9  }
 0x252   : > { %s331_s4 = scalar_lea.sflag [#allocation3], %s330_s3 }
 0x253   : > { %p409_p0 = pnand %p412_p13, %p582_p6 }
 0x255   : > { %p410_p1 = pneg %p409_p0 }
 0x257   : > { %504 = dma.done.wait (%p410_p1), %s331_s4, 128  }
 0x258   : > { %506 = vsyncadd (%p410_p1), %s331_s4, 4294967168  ;;  %p12_p2 = scmp.ge.s32.totalorder %s565_s15, 4   ;;  %s641_s9 = smov %s513_s10 }
 0x259   : > { %s642_s10 = smov %s517_s11  ;;  %s643_s11 = smov %s576_s18 }
 0x25a   : > { %s644_s12 = smov %s565_s15  ;;  %14 = sbr.rel (!%p12_p2) target bundleno = 3 (0x3), region = 66 }
 0x25f   :  { %336 = vsyncpa [#allocation3], 1 }
 0x260   :  { %338 = vsyncpa [#allocation3 + $0x1], 1 }

</bundles_post_ra>
